<compile_context>
chip_gen: v7x
topology: tpu7x:2x2x1
jax: 0.10.0
libtpu: 0.0.40
codegen_flags: <defaults>
</compile_context>

<pallas_src>
import functools
import math

import jax
import jax.numpy as jnp
from jax import lax
from jax.experimental import pallas as pl
from jax.experimental.pallas import tpu as pltpu

d_k = d_v = 64      # module-level constants from the PyTorch spec


# ------------------------------ Pallas kernel --------------------------------

def _mha_attention_kernel(q_ref, k_ref, v_ref, m_ref, o_ref, *,
                          n_heads, mask_heads, scale):
    """One batch element per grid step; all heads processed in-kernel.

    q_ref, k_ref : (H, S, d_k)   native torch layout (no host-side transposes)
    v_ref        : (H, S, d_v)
    m_ref        : (Hm, Sm, S)   Hm in {1, H}, Sm in {1, S}; nonzero == masked
    o_ref        : (H, S, d_v)
    """
    mask = m_ref[...] != 0                                 # loaded once, hoisted
    for h in range(n_heads):                               # static unroll (small H)
        q = q_ref[h]                                       # (S, d_k) whole-block load
        k = k_ref[h]                                       # (S, d_k)
        v = v_ref[h]                                       # (S, d_v)
        # scores = Q @ K^T / sqrt(d_k): contract last dims, no explicit K transpose.
        s = lax.dot_general(q, k, (((1,), (1,)), ((), ())),
                            preferred_element_type=jnp.float32) * scale
        mh = mask[h] if mask_heads > 1 else mask[0]        # (Sm, S) -> broadcast over rows
        s = jnp.where(mh, -1e9, s)                         # masked_fill_(attn_mask, -1e9)
        s = s - jnp.max(s, axis=-1, keepdims=True)         # numerically stable softmax
        p = jnp.exp(s)
        inv = pl.reciprocal(jnp.sum(p, axis=-1, keepdims=True), approx=True)  # EUP slot
        ctx = jnp.dot(p * inv, v, preferred_element_type=jnp.float32)
        o_ref[h] = ctx.astype(o_ref.dtype)                 # whole-block per-head store


def scaled_dot_product_attention(Q, K, V, attn_mask):
    """PyTorch-shaped interface matching the module.

    Q, K : (B, H, S, d_k)   V : (B, H, S, d_v)
    attn_mask : bool/int; (B, S) key-pad row, (B, S, S), (B, 1, S, S) or
                (B, H, S, S) (per-head masks supported exactly).
    Returns context (B, H, S, d_v).
    """
    B, H, S, dk = Q.shape
    dv = V.shape[-1]

    m = attn_mask
    if m.ndim == 2:                  # (B, S) key-pad row -> (B, 1, 1, S)
        m = m[:, None, None, :]
    elif m.ndim == 3:                # (B, S, S) / (B, 1, S) -> (B, 1, S|1, S)
        m = m[:, None, :, :]
    assert m.ndim == 4 and m.shape[0] == B and m.shape[-1] == S
    assert m.shape[1] in (1, H) and m.shape[2] in (1, S)
    m = m.astype(jnp.int32)
    Hm, Sm = m.shape[1], m.shape[2]

    kernel = functools.partial(
        _mha_attention_kernel, n_heads=H, mask_heads=Hm,
        scale=1.0 / math.sqrt(d_k))   # torch module scales by the global d_k (=64)

    return pl.pallas_call(
        kernel,
        out_shape=jax.ShapeDtypeStruct((B, H, S, dv), Q.dtype),
        grid=(B,),
        in_specs=[
            pl.BlockSpec((None, H, S, dk), lambda b: (b, 0, 0, 0)),
            pl.BlockSpec((None, H, S, dk), lambda b: (b, 0, 0, 0)),
            pl.BlockSpec((None, H, S, dv), lambda b: (b, 0, 0, 0)),
            pl.BlockSpec((None, Hm, Sm, S), lambda b: (b, 0, 0, 0)),
        ],
        out_specs=pl.BlockSpec((None, H, S, dv), lambda b: (b, 0, 0, 0)),
        compiler_params=pltpu.CompilerParams(
            dimension_semantics=("parallel",)),
    )(Q, K, V, m)


# ------------------------------ reference ------------------------------------

def _reference(Q, K, V, attn_mask):
    scores = jnp.einsum("bhqd,bhkd->bhqk", Q, K) / math.sqrt(d_k)
    scores = jnp.where(attn_mask, -1e9, scores)
    attn = jax.nn.softmax(scores, axis=-1)
    return jnp.einsum("bhqk,bhkd->bhqd", attn, V)


# --------------------------------- main ---------------------------------------

if __name__ == "__main__":
    B, H, S = 2, 2, 8
    key = jax.random.PRNGKey(0)
    kq, kk, kv = jax.random.split(key, 3)
    Q = jax.random.normal(kq, (B, H, S, d_k), dtype=jnp.float32)
    K = jax.random.normal(kk, (B, H, S, d_k), dtype=jnp.float32)
    V = jax.random.normal(kv, (B, H, S, d_v), dtype=jnp.float32)

    # BERT-style key-pad mask (mask keys where token id == 0).
    input_ids = jnp.array([[1, 4, 5, 3, 6, 2, 0, 0],
                           [1, 7, 3, 6, 2, 0, 0, 0]], dtype=jnp.int32)
    key_is_pad = (input_ids == 0)                                        # (B, S)

    # Full (B, H, S, S) mask, intentionally different per head to exercise the
    # exact per-head path: head 0 = pad mask only, head 1 = pad mask | causal.
    pad4 = jnp.broadcast_to(key_is_pad[:, None, None, :], (B, H, S, S))
    causal = jnp.triu(jnp.ones((S, S), jnp.int32), k=1).astype(bool)
    head_mask = jnp.stack([jnp.zeros((S, S), dtype=bool), causal])       # (H, S, S)
    attn_mask_4d = pad4 | head_mask[None]

    ctx = scaled_dot_product_attention(Q, K, V, attn_mask_4d)
    jax.block_until_ready(ctx)
    ref = _reference(Q, K, V, attn_mask_4d)
    assert ctx.shape == (B, H, S, d_v)
    assert bool(jnp.all(jnp.isfinite(ctx)))
    assert bool(jnp.allclose(ctx, ref, atol=5e-3, rtol=5e-3))

    # Key-pad fast path: (B, S) mask -> a (1, 1, S) block DMA per grid step.
    ctx2 = scaled_dot_product_attention(Q, K, V, key_is_pad)
    jax.block_until_ready(ctx2)
    ref2 = _reference(Q, K, V, jnp.broadcast_to(key_is_pad[:, None, None, :],
                                                (B, H, S, S)))
    assert bool(jnp.allclose(ctx2, ref2, atol=5e-3, rtol=5e-3))

    print("KERNEL_OK")
</pallas_src>

<mosaic_0001>
module attributes {stable_mosaic.version = 11 : i64} {
  func.func @_mha_attention_kernel(%arg0: i32, %arg1: memref<1x2x8x64xf32, #tpu.memory_space<vmem>>, %arg2: memref<1x2x8x64xf32, #tpu.memory_space<vmem>>, %arg3: memref<1x2x8x64xf32, #tpu.memory_space<vmem>>, %arg4: memref<1x2x8x8xi32, #tpu.memory_space<vmem>>, %arg5: memref<1x2x8x64xf32, #tpu.memory_space<vmem>>) attributes {dimension_semantics = [#tpu.dimension_semantics<parallel>], iteration_bounds = array<i64: 2>, scalar_prefetch = 0 : i64, scratch_operands = 0 : i64, tpu.core_type = #tpu.core_type<tc>, window_params = [{transform_indices = @transform_0, window_bounds = array<i64: 1, 2, 8, 64>}, {transform_indices = @transform_1, window_bounds = array<i64: 1, 2, 8, 64>}, {transform_indices = @transform_2, window_bounds = array<i64: 1, 2, 8, 64>}, {transform_indices = @transform_3, window_bounds = array<i64: 1, 2, 8, 8>}, {transform_indices = @transform_4, window_bounds = array<i64: 1, 2, 8, 64>}]} {
    %c0 = arith.constant 0 : index
    %c0_0 = arith.constant 0 : index
    %c0_1 = arith.constant 0 : index
    %c0_2 = arith.constant 0 : index
    %0 = vector.load %arg4[%c0, %c0_0, %c0_1, %c0_2] : memref<1x2x8x8xi32, #tpu.memory_space<vmem>>, vector<1x2x8x8xi32>
    %1 = vector.shape_cast %0 : vector<1x2x8x8xi32> to vector<2x8x8xi32>
    %c0_i32 = arith.constant 0 : i32
    %2 = vector.broadcast %c0_i32 : i32 to vector<2x8x8xi32>
    %3 = arith.cmpi ne, %1, %2 : vector<2x8x8xi32>
    %c0_3 = arith.constant 0 : index
    %c0_4 = arith.constant 0 : index
    %c0_5 = arith.constant 0 : index
    %c0_6 = arith.constant 0 : index
    %4 = vector.load %arg1[%c0_3, %c0_4, %c0_5, %c0_6] : memref<1x2x8x64xf32, #tpu.memory_space<vmem>>, vector<1x1x8x64xf32>
    %5 = vector.shape_cast %4 : vector<1x1x8x64xf32> to vector<8x64xf32>
    %c0_7 = arith.constant 0 : index
    %c0_8 = arith.constant 0 : index
    %c0_9 = arith.constant 0 : index
    %c0_10 = arith.constant 0 : index
    %6 = vector.load %arg2[%c0_7, %c0_8, %c0_9, %c0_10] : memref<1x2x8x64xf32, #tpu.memory_space<vmem>>, vector<1x1x8x64xf32>
    %7 = vector.shape_cast %6 : vector<1x1x8x64xf32> to vector<8x64xf32>
    %c0_11 = arith.constant 0 : index
    %c0_12 = arith.constant 0 : index
    %c0_13 = arith.constant 0 : index
    %c0_14 = arith.constant 0 : index
    %8 = vector.load %arg3[%c0_11, %c0_12, %c0_13, %c0_14] : memref<1x2x8x64xf32, #tpu.memory_space<vmem>>, vector<1x1x8x64xf32>
    %9 = vector.shape_cast %8 : vector<1x1x8x64xf32> to vector<8x64xf32>
    %cst = arith.constant dense<0.000000e+00> : vector<8x8xf32>
    %10 = tpu.matmul %5, %7, %cst {dimension_numbers = #tpu.dot_dimension_numbers<[1], [1], [0], [0], [0, 0, 1, 0], [], []>} : vector<8x64xf32>, vector<8x64xf32>, vector<8x8xf32> -> vector<8x8xf32>
    %cst_15 = arith.constant 1.250000e-01 : f32
    %11 = vector.broadcast %cst_15 : f32 to vector<8x8xf32>
    %12 = arith.mulf %10, %11 : vector<8x8xf32>
    %13 = vector.extract_strided_slice %3 {offsets = [0, 0, 0], sizes = [1, 8, 8], strides = [1, 1, 1]} : vector<2x8x8xi1> to vector<1x8x8xi1>
    %14 = vector.shape_cast %13 : vector<1x8x8xi1> to vector<8x8xi1>
    %cst_16 = arith.constant -1.000000e+09 : f32
    %15 = vector.broadcast %cst_16 : f32 to vector<8x8xf32>
    %16 = arith.select %14, %15, %12 : vector<8x8xi1>, vector<8x8xf32>
    %cst_17 = arith.constant dense<0xFF800000> : vector<8xf32>
    %17 = vector.multi_reduction <maximumf>, %16, %cst_17 [1] : vector<8x8xf32> to vector<8xf32>
    %18 = vector.shape_cast %17 : vector<8xf32> to vector<8x1xf32>
    %19 = vector.broadcast %18 : vector<8x1xf32> to vector<8x8xf32>
    %20 = arith.subf %16, %19 : vector<8x8xf32>
    %21 = math.exp %20 : vector<8x8xf32>
    %cst_18 = arith.constant dense<0.000000e+00> : vector<8xf32>
    %22 = vector.multi_reduction <add>, %21, %cst_18 [1] : vector<8x8xf32> to vector<8xf32>
    %23 = vector.shape_cast %22 : vector<8xf32> to vector<8x1xf32>
    %24 = tpu.reciprocal %23 {approx = true} : vector<8x1xf32> -> vector<8x1xf32>
    %25 = vector.broadcast %24 : vector<8x1xf32> to vector<8x8xf32>
    %26 = arith.mulf %21, %25 : vector<8x8xf32>
    %cst_19 = arith.constant dense<0.000000e+00> : vector<8x64xf32>
    %27 = tpu.matmul %26, %9, %cst_19 {dimension_numbers = #tpu.dot_dimension_numbers<[1], [0], [0], [1], [0, 0, 1, 1], [], []>} : vector<8x8xf32>, vector<8x64xf32>, vector<8x64xf32> -> vector<8x64xf32>
    %c0_20 = arith.constant 0 : index
    %c0_21 = arith.constant 0 : index
    %c0_22 = arith.constant 0 : index
    %c0_23 = arith.constant 0 : index
    %28 = vector.load %arg5[%c0_20, %c0_21, %c0_22, %c0_23] : memref<1x2x8x64xf32, #tpu.memory_space<vmem>>, vector<1x1x8x64xf32>
    %29 = vector.shape_cast %28 : vector<1x1x8x64xf32> to vector<8x64xf32>
    %30 = vector.shape_cast %27 : vector<8x64xf32> to vector<1x1x8x64xf32>
    tpu.vector_store %arg5[%c0_20, %c0_21, %c0_22, %c0_23], %30 {strides = array<i32>} : memref<1x2x8x64xf32, #tpu.memory_space<vmem>>, vector<1x1x8x64xf32>,
    %c0_24 = arith.constant 0 : index
    %c1 = arith.constant 1 : index
    %c0_25 = arith.constant 0 : index
    %c0_26 = arith.constant 0 : index
    %31 = vector.load %arg1[%c0_24, %c1, %c0_25, %c0_26] : memref<1x2x8x64xf32, #tpu.memory_space<vmem>>, vector<1x1x8x64xf32>
    %32 = vector.shape_cast %31 : vector<1x1x8x64xf32> to vector<8x64xf32>
    %c0_27 = arith.constant 0 : index
    %c1_28 = arith.constant 1 : index
    %c0_29 = arith.constant 0 : index
    %c0_30 = arith.constant 0 : index
    %33 = vector.load %arg2[%c0_27, %c1_28, %c0_29, %c0_30] : memref<1x2x8x64xf32, #tpu.memory_space<vmem>>, vector<1x1x8x64xf32>
    %34 = vector.shape_cast %33 : vector<1x1x8x64xf32> to vector<8x64xf32>
    %c0_31 = arith.constant 0 : index
    %c1_32 = arith.constant 1 : index
    %c0_33 = arith.constant 0 : index
    %c0_34 = arith.constant 0 : index
    %35 = vector.load %arg3[%c0_31, %c1_32, %c0_33, %c0_34] : memref<1x2x8x64xf32, #tpu.memory_space<vmem>>, vector<1x1x8x64xf32>
    %36 = vector.shape_cast %35 : vector<1x1x8x64xf32> to vector<8x64xf32>
    %cst_35 = arith.constant dense<0.000000e+00> : vector<8x8xf32>
    %37 = tpu.matmul %32, %34, %cst_35 {dimension_numbers = #tpu.dot_dimension_numbers<[1], [1], [0], [0], [0, 0, 1, 0], [], []>} : vector<8x64xf32>, vector<8x64xf32>, vector<8x8xf32> -> vector<8x8xf32>
    %cst_36 = arith.constant 1.250000e-01 : f32
    %38 = vector.broadcast %cst_36 : f32 to vector<8x8xf32>
    %39 = arith.mulf %37, %38 : vector<8x8xf32>
    %40 = vector.extract_strided_slice %3 {offsets = [1, 0, 0], sizes = [1, 8, 8], strides = [1, 1, 1]} : vector<2x8x8xi1> to vector<1x8x8xi1>
    %41 = vector.shape_cast %40 : vector<1x8x8xi1> to vector<8x8xi1>
    %cst_37 = arith.constant -1.000000e+09 : f32
    %42 = vector.broadcast %cst_37 : f32 to vector<8x8xf32>
    %43 = arith.select %41, %42, %39 : vector<8x8xi1>, vector<8x8xf32>
    %cst_38 = arith.constant dense<0xFF800000> : vector<8xf32>
    %44 = vector.multi_reduction <maximumf>, %43, %cst_38 [1] : vector<8x8xf32> to vector<8xf32>
    %45 = vector.shape_cast %44 : vector<8xf32> to vector<8x1xf32>
    %46 = vector.broadcast %45 : vector<8x1xf32> to vector<8x8xf32>
    %47 = arith.subf %43, %46 : vector<8x8xf32>
    %48 = math.exp %47 : vector<8x8xf32>
    %cst_39 = arith.constant dense<0.000000e+00> : vector<8xf32>
    %49 = vector.multi_reduction <add>, %48, %cst_39 [1] : vector<8x8xf32> to vector<8xf32>
    %50 = vector.shape_cast %49 : vector<8xf32> to vector<8x1xf32>
    %51 = tpu.reciprocal %50 {approx = true} : vector<8x1xf32> -> vector<8x1xf32>
    %52 = vector.broadcast %51 : vector<8x1xf32> to vector<8x8xf32>
    %53 = arith.mulf %48, %52 : vector<8x8xf32>
    %cst_40 = arith.constant dense<0.000000e+00> : vector<8x64xf32>
    %54 = tpu.matmul %53, %36, %cst_40 {dimension_numbers = #tpu.dot_dimension_numbers<[1], [0], [0], [1], [0, 0, 1, 1], [], []>} : vector<8x8xf32>, vector<8x64xf32>, vector<8x64xf32> -> vector<8x64xf32>
    %c0_41 = arith.constant 0 : index
    %c1_42 = arith.constant 1 : index
    %c0_43 = arith.constant 0 : index
    %c0_44 = arith.constant 0 : index
    %55 = vector.load %arg5[%c0_41, %c1_42, %c0_43, %c0_44] : memref<1x2x8x64xf32, #tpu.memory_space<vmem>>, vector<1x1x8x64xf32>
    %56 = vector.shape_cast %55 : vector<1x1x8x64xf32> to vector<8x64xf32>
    %57 = vector.shape_cast %54 : vector<8x64xf32> to vector<1x1x8x64xf32>
    tpu.vector_store %arg5[%c0_41, %c1_42, %c0_43, %c0_44], %57 {strides = array<i32>} : memref<1x2x8x64xf32, #tpu.memory_space<vmem>>, vector<1x1x8x64xf32>,
    return
  }
  func.func @transform_0(%arg0: i32) -> (i32, i32, i32, i32) {
    %c0_i32 = arith.constant 0 : i32
    %c0_i32_0 = arith.constant 0 : i32
    %c0_i32_1 = arith.constant 0 : i32
    %c0_i32_2 = arith.constant 0 : i32
    return %arg0, %c0_i32, %c0_i32_0, %c0_i32_1 : i32, i32, i32, i32
  }
  func.func @transform_1(%arg0: i32) -> (i32, i32, i32, i32) {
    %c0_i32 = arith.constant 0 : i32
    %c0_i32_0 = arith.constant 0 : i32
    %c0_i32_1 = arith.constant 0 : i32
    %c0_i32_2 = arith.constant 0 : i32
    return %arg0, %c0_i32, %c0_i32_0, %c0_i32_1 : i32, i32, i32, i32
  }
  func.func @transform_2(%arg0: i32) -> (i32, i32, i32, i32) {
    %c0_i32 = arith.constant 0 : i32
    %c0_i32_0 = arith.constant 0 : i32
    %c0_i32_1 = arith.constant 0 : i32
    %c0_i32_2 = arith.constant 0 : i32
    return %arg0, %c0_i32, %c0_i32_0, %c0_i32_1 : i32, i32, i32, i32
  }
  func.func @transform_3(%arg0: i32) -> (i32, i32, i32, i32) {
    %c0_i32 = arith.constant 0 : i32
    %c0_i32_0 = arith.constant 0 : i32
    %c0_i32_1 = arith.constant 0 : i32
    %c0_i32_2 = arith.constant 0 : i32
    return %arg0, %c0_i32, %c0_i32_0, %c0_i32_1 : i32, i32, i32, i32
  }
  func.func @transform_4(%arg0: i32) -> (i32, i32, i32, i32) {
    %c0_i32 = arith.constant 0 : i32
    %c0_i32_0 = arith.constant 0 : i32
    %c0_i32_1 = arith.constant 0 : i32
    %c0_i32_2 = arith.constant 0 : i32
    return %arg0, %c0_i32, %c0_i32_0, %c0_i32_1 : i32, i32, i32, i32
  }
}

</mosaic_0001>

<bundles_post_ra>
// kernel: tpu_custom_call.1
= control target key start
LH: loop header
LB: loop body
LE: loop exit
PB: predicated region body
PF: predicated region fallthrough
CT: control target
= control target key end

     0   :  { %s1543_s0 = inlined_call_operand.hbm [shape: f32[2,2,8,64], index: 0, kind: input, shape index: {}]   ;;  %s1544_s1 = inlined_call_operand.hbm [shape: f32[2,2,8,64], index: 1, kind: input, shape index: {}]   ;;  %s1545_s2 = inlined_call_operand.hbm [shape: f32[2,2,8,64], index: 2, kind: input, shape index: {}]   ;;  %s1546_s3 = inlined_call_operand.hbm [shape: s32[2,2,8,8], index: 3, kind: input, shape index: {}]   ;;  %s1547_s4 = inlined_call_operand.hbm [shape: f32[2,2,8,64], index: 4, kind: output, shape index: {}]  }
   0x1   :  { %1554 = sst [smem:[#allocation16_spill]] %s1543_s0 }
   0x2   :  { %1555 = sst [smem:[#allocation17_spill]] %s1544_s1 }
   0x3   :  { %9 = vsyncpa [#allocation3], 0 }
   0x4   :  { %11 = vsyncpa [#allocation3 + $0x1], 0 }
   0x5   :  { %12 = vsyncpa [#allocation6], 0 }
   0x6   :  { %14 = vsyncpa [#allocation6 + $0x1], 0 }
   0x7   :  { %15 = vsyncpa [#allocation9], 0 }
   0x8   :  { %17 = vsyncpa [#allocation9 + $0x1], 0 }
   0x9   :  { %18 = vsyncpa [#allocation4], 0 }
   0xa   :  { %20 = vsyncpa [#allocation4 + $0x1], 0  ;;  %s1204_s15 = smov 0   ;;  %s1206_s16 = smov 0  }
   0xb   :  { %s1208_s17 = smov 0   ;;  %s1210_s18 = smov 0  }
   0xc LB: > { %s1225_s19 = sadd.s32 4294967295, %s1166_s18   ;;  %s828_s20 = sadd.s32 4294967294, %s1166_s18   ;;  %s1166_s18 = sphi %s1210_s18, %s1577_s18   ;;  %s1162_s17 = sphi %s1208_s17, %s1576_s17   ;;  %s1158_s16 = sphi %s1206_s16, %s1575_s16   ;;  %s1154_s15 = sphi %s1204_s15, %s1574_s15  }
   0xd   : > { %s1229_s21 = sadd.s32 1, %s1166_s18   ;;  %s33_s22 = sadd.s32 1, %s1162_s17 }
   0xe   : > { %s30_s23 = ssub.s32 %s1166_s18, %s1229_s21  ;;  %p40_p0 = scmp.ne.s32.totalorder %s1162_s17, %s1158_s16 }
   0xf   : > { %p31_p1 = scmp.eq.s32.totalorder %s30_s23, 0  ;;  %p41_p2 = scmp.eq.s32.totalorder %s1166_s18, 0 }
  0x10   : > { %p46_p3 = scmp.ne.s32.totalorder %s1158_s16, %s1154_s15  ;;  %p47_p4 = scmp.eq.s32.totalorder %s1225_s19, 0 }
  0x11   : > { %s1241_s24 = scalar_select %p31_p1, %s1162_s17, %s33_s22  }
  0x12   : > { %p42_p5 = por %p41_p2, %p40_p0  ;;  %p1243_p6 = por %p47_p4, %p46_p3 }
  0x13   : > { %1556 = sst [smem:[#allocation15_spill]] %s1241_s24  ;;  %p148_p7 = scmp.eq.s32.totalorder %s1225_s19, 1 }
  0x14   : > { %s1557_s25 = scalar_select %p1243_p6, 1, 0 }
  0x15   : > { %p154_p8 = scmp.eq.s32.totalorder %s828_s20, 1  ;;  %p924_p10 = scmp.lt.s32.totalorder %s1166_s18, 2 }
  0x16   : > { %p1250_p11 = por %p148_p7, %p40_p0  ;;  %s1259_s28 = sand.u32 1, %s1162_s17  }
  0x17   : > { %p1254_p12 = por %p154_p8, %p46_p3  ;;  %s1262_s29 = sshll.u32 %s1166_s18, 8 }
  0x18   : > { %s1558_s26 = scalar_select %p1250_p11, 1, 0 }
  0x19   : > { %s1559_s27 = scalar_select %p1254_p12, 1, 0 }
  0x1a   : > { %s1265_s30 = sshll.u32 %s1259_s28, 4  ;;  %p1267_p13 = pnand %p924_p10, %p42_p5 }
  0x1b   : > { %s195_s6 = sand.u32 1, %s1166_s18   ;;  %s1561_s1 = sld [smem:[#allocation17_spill]] }
  0x1c   : > { %s199_s10 = scalar_lea.vmem [#allocation5], %s1265_s30  ;;  %s1282_s12 = scalar_lea.sflag [#allocation6], %s195_s6 }
  0x1d   : > { %s206_s11 = sshll.u32 %s199_s10, 4  ;;  %p1288_p2 = pneg %p1267_p13  ;;  %s1279_s11 = int_to_ptr.vmem [resolvable:$true] %s206_s11 }
  0x21   : > { %s1276_s9 = scalar_lea.hbm %s1561_s1, %s1262_s29  ;;  %s977_s23 = scalar_lea.hbm %s1561_s1, 512 }
  0x22   : > { %s972_s13 = scalar_lea.hbm %s1276_s9, 256  ;;  %p978_p5 = scmp.lt.u32.totalorder %s1276_s9, %s1561_s1 }
  0x23   : > { %p973_p1 = scmp.ne.s32.totalorder %s1276_s9, %s972_s13  ;;  %p979_p7 = scmp.lt.u32.totalorder %s977_s23, %s972_s13 }
  0x24   : > { %p981_p10 = scmp.lt.u32.totalorder %s972_s13, %s1276_s9 }
  0x25   : > { %p975_p3 = pnand %p1288_p2, %p973_p1  ;;  %p980_p8 = por %p979_p7, %p978_p5 }
  0x27   : > { %p976_p4 = pneg %p975_p3  ;;  %p982_p9 = por %p981_p10, %p980_p8 }
  0x29   : > { %p983_p0 = pnand %p982_p9, %p976_p4 }
  0x2b   : > { %986 = shalt.err (!%p983_p0)
}
  0x2c   : > { %s987_s6 = scalar_lea.vmem %s1279_s11, 256  ;;  %s1168_s10 = smov [#allocation5]  }
  0x2d   : > { %p988_p1 = scmp.ne.s32.totalorder %s1279_s11, %s987_s6  ;;  %s992_s20 = sshll.u32 %s1168_s10, 4  ;;  %s993_s20 = int_to_ptr.vmem [resolvable:$false] %s992_s20 }
  0x2e   : > { %s994_s22 = scalar_lea.vmem %s993_s20, 512  ;;  %p995_p11 = scmp.lt.s32.totalorder %s1279_s11, %s993_s20 }
  0x2f   : > { %p990_p3 = pnand %p988_p1, %p1288_p2  ;;  %p996_p6 = scmp.lt.s32.totalorder %s994_s22, %s987_s6 }
  0x31   : > { %p991_p12 = pneg %p990_p3  ;;  %p997_p5 = por %p996_p6, %p995_p11 }
  0x33   : > { %p998_p7 = pnand %p997_p5, %p991_p12 }
  0x35   : > { %1001 = shalt.err (!%p998_p7)
}
  0x36   : > { %s1550_s13 = smov 128   ;;  %s1552_s23 = smov 8  }
  0x37   : > { %913 = dma.hbm_to_vmem [thread:$0]  (!%p1267_p13), %s1276_s9, 256, %s1279_s11, %s1282_s12, %s1550_s13, %s1550_s13, %s1552_s23  }
  0x38   : > { %p256_p6 = scmp.lt.s32.totalorder %s1166_s18, 3  ;;  %s1563_s0 = sld [smem:[#allocation16_spill]] }
  0x39   : > { %p1564_p9 = scmp.ge.s32.totalorder %s1166_s18, 1  ;;  %s178_s20 = scalar_lea.vmem [#allocation2], %s1265_s30 }
  0x3a   : > { %s185_s22 = sshll.u32 %s178_s20, 4  ;;  %s175_s9 = scalar_lea.sflag [#allocation3], %s1259_s28  ;;  %s1329_s22 = int_to_ptr.vmem [resolvable:$true] %s185_s22 }
  0x3b   : > { %p1324_p11 = pnand %p1564_p9, %p256_p6 }
  0x3d   : > { %s1565_s10 = scalar_select %p1324_p11, 1, 0 }
  0x3e   : > { %s1320_s6 = scalar_lea.hbm %s1563_s0, %s1262_s29  ;;  %s1007_s13 = scalar_lea.hbm %s1563_s0, 512 }
  0x3f   : > { %s1002_s11 = scalar_lea.hbm %s1320_s6, 256  ;;  %p1008_p8 = scmp.lt.u32.totalorder %s1320_s6, %s1563_s0 }
  0x40   : > { %p1003_p12 = scmp.ne.s32.totalorder %s1320_s6, %s1002_s11  ;;  %p1009_p10 = scmp.lt.u32.totalorder %s1007_s13, %s1002_s11 }
  0x41   : > { %p1011_p3 = scmp.lt.u32.totalorder %s1002_s11, %s1320_s6 }
  0x42   : > { %p1005_p0 = pnand %p1003_p12, %p1288_p2  ;;  %p1010_p1 = por %p1009_p10, %p1008_p8 }
  0x44   : > { %p1006_p4 = pneg %p1005_p0  ;;  %p1012_p5 = por %p1011_p3, %p1010_p1 }
  0x46   : > { %p1013_p7 = pnand %p1012_p5, %p1006_p4 }
  0x48   : > { %1016 = shalt.err (!%p1013_p7)
}
  0x49   : > { %s1017_s20 = scalar_lea.vmem %s1329_s22, 256  ;;  %s1171_s7 = smov [#allocation2]  }
  0x4a   : > { %p1018_p6 = scmp.ne.s32.totalorder %s1329_s22, %s1017_s20  ;;  %s1022_s8 = sshll.u32 %s1171_s7, 4  ;;  %s1023_s8 = int_to_ptr.vmem [resolvable:$false] %s1022_s8 }
  0x4b   : > { %s1024_s1 = scalar_lea.vmem %s1023_s8, 512  ;;  %p1025_p0 = scmp.lt.s32.totalorder %s1329_s22, %s1023_s8 }
  0x4c   : > { %p1020_p9 = pnand %p1018_p6, %p1288_p2  ;;  %p1026_p11 = scmp.lt.s32.totalorder %s1024_s1, %s1017_s20 }
  0x4e   : > { %p1021_p12 = pneg %p1020_p9  ;;  %p1027_p8 = por %p1026_p11, %p1025_p0 }
  0x50   : > { %p1028_p10 = pnand %p1027_p8, %p1021_p12 }
  0x52   : > { %1031 = shalt.err (!%p1028_p10)
}
  0x53   : > { %s1566_s13 = smov 8   ;;  %s1567_s23 = smov 128  }
  0x54   : > { %910 = dma.hbm_to_vmem [thread:$0]  (!%p1267_p13), %s1320_s6, 256, %s1329_s22, %s175_s9, %s1567_s23, %s1567_s23, %s1566_s13  }
  0x55   : > { %s1362_s20 = scalar_lea.hbm %s1545_s2, %s1262_s29  ;;  %s220_s8 = scalar_lea.vmem [#allocation7], %s1265_s30 }
  0x56   : > { %s227_s1 = sshll.u32 %s220_s8, 4  ;;  %s1032_s0 = scalar_lea.hbm %s1362_s20, 256  ;;  %s1365_s1 = int_to_ptr.vmem [resolvable:$true] %s227_s1 }
  0x57   : > { %p1033_p11 = scmp.ne.s32.totalorder %s1362_s20, %s1032_s0  ;;  %s1037_s22 = scalar_lea.hbm %s1545_s2, 512 }
  0x58   : > { %p1038_p3 = scmp.lt.u32.totalorder %s1362_s20, %s1545_s2  ;;  %p1039_p5 = scmp.lt.u32.totalorder %s1037_s22, %s1032_s0 }
  0x59   : > { %p1035_p4 = pnand %p1033_p11, %p1288_p2  ;;  %p1041_p6 = scmp.lt.u32.totalorder %s1032_s0, %s1362_s20 }
  0x5a   : > { %p1040_p7 = por %p1039_p5, %p1038_p3 }
  0x5b   : > { %p1036_p1 = pneg %p1035_p4 }
  0x5c   : > { %p1042_p9 = por %p1041_p6, %p1040_p7 }
  0x5e   : > { %p1043_p12 = pnand %p1042_p9, %p1036_p1 }
  0x60   : > { %1046 = shalt.err (!%p1043_p12)
}
  0x61   : > { %s1047_s7 = scalar_lea.vmem %s1365_s1, 256  ;;  %s1172_s24 = smov [#allocation7]  }
  0x62   : > { %p1048_p0 = scmp.ne.s32.totalorder %s1365_s1, %s1047_s7  ;;  %s1052_s8 = sshll.u32 %s1172_s24, 4  ;;  %s1053_s8 = int_to_ptr.vmem [resolvable:$false] %s1052_s8 }
  0x63   : > { %s1054_s6 = scalar_lea.vmem %s1053_s8, 512  ;;  %p1055_p11 = scmp.lt.s32.totalorder %s1365_s1, %s1053_s8 }
  0x64   : > { %p1050_p8 = pnand %p1048_p0, %p1288_p2  ;;  %p1056_p4 = scmp.lt.s32.totalorder %s1054_s6, %s1047_s7 }
  0x66   : > { %p1051_p10 = pneg %p1050_p8  ;;  %p1057_p3 = por %p1056_p4, %p1055_p11 }
  0x68   : > { %p1058_p5 = pnand %p1057_p3, %p1051_p10 }
  0x6a   : > { %1061 = shalt.err (!%p1058_p5)
}
  0x6b   : > { %916 = dma.hbm_to_vmem [thread:$0]  (!%p1267_p13), %s1362_s20, 256, %s1365_s1, %s1282_s12, %s1567_s23, %s1567_s23, %s1566_s13  }
  0x6c   : > { %s1396_s9 = scalar_lea.hbm %s1546_s3, %s1262_s29  ;;  %s241_s11 = scalar_lea.vmem [#allocation8], %s1265_s30 }
  0x6d   : > { %s248_s7 = sshll.u32 %s241_s11, 4  ;;  %s238_s24 = scalar_lea.sflag [#allocation9], %s1259_s28  ;;  %s1399_s7 = int_to_ptr.vmem [resolvable:$true] %s248_s7 }
  0x6e   : > { %s1062_s8 = scalar_lea.hbm %s1396_s9, 256  ;;  %s1067_s1 = scalar_lea.hbm %s1546_s3, 512 }
  0x6f   : > { %p1063_p1 = scmp.ne.s32.totalorder %s1396_s9, %s1062_s8  ;;  %p1068_p9 = scmp.lt.u32.totalorder %s1396_s9, %s1546_s3 }
  0x70   : > { %p1069_p12 = scmp.lt.u32.totalorder %s1067_s1, %s1062_s8  ;;  %p1071_p8 = scmp.lt.u32.totalorder %s1062_s8, %s1396_s9 }
  0x71   : > { %p1065_p7 = pnand %p1063_p1, %p1288_p2 }
  0x72   : > { %p1070_p0 = por %p1069_p12, %p1068_p9 }
  0x73   : > { %p1066_p6 = pneg %p1065_p7 }
  0x74   : > { %p1072_p10 = por %p1071_p8, %p1070_p0 }
  0x76   : > { %p1073_p11 = pnand %p1072_p10, %p1066_p6 }
  0x78   : > { %1076 = shalt.err (!%p1073_p11)
}
  0x79   : > { %s1077_s30 = scalar_lea.vmem %s1399_s7, 256  ;;  %s1173_s0 = smov [#allocation8]  }
  0x7a   : > { %p1078_p4 = scmp.ne.s32.totalorder %s1399_s7, %s1077_s30  ;;  %s1082_s22 = sshll.u32 %s1173_s0, 4  ;;  %s1083_s22 = int_to_ptr.vmem [resolvable:$false] %s1082_s22 }
  0x7b   : > { %s1084_s11 = scalar_lea.vmem %s1083_s22, 512  ;;  %p1085_p1 = scmp.lt.s32.totalorder %s1399_s7, %s1083_s22 }
  0x7c   : > { %p1080_p3 = pnand %p1078_p4, %p1288_p2  ;;  %p1086_p7 = scmp.lt.s32.totalorder %s1084_s11, %s1077_s30 }
  0x7e   : > { %p1081_p5 = pneg %p1080_p3  ;;  %p1087_p9 = por %p1086_p7, %p1085_p1 }
  0x80   : > { %p1088_p12 = pnand %p1087_p9, %p1081_p5 }
  0x82   : > { %1091 = shalt.err (!%p1088_p12)
}
  0x83   : > { %919 = dma.hbm_to_vmem [thread:$0]  (!%p1267_p13), %s1396_s9, 256, %s1399_s7, %s238_s24, %s1567_s23, %s1567_s23, %s1566_s13  }
  0x84   : > { %p1568_p2 = scmp.ne.s32.totalorder %s1565_s10, 0 }
  0x85   : > { %s1431_s14 = sand.u32 (!%p1568_p2), 1, %s1158_s16   ;;  %p1569_p6 = scmp.ne.s32.totalorder (!%p1568_p2), %s1557_s25, 0 }
  0x86   : > { %260 = sbr.rel (%p1568_p2) target bundleno = 1443 (0x5a3), region = 36  ;;  %s1434_s8 = sshll.u32 (!%p1568_p2), %s1431_s14, 4 }
  0x87   : > { %s263_s5 = scalar_lea.sflag (!%p1568_p2), [#allocation3], %s1431_s14  ;;  %s266_s12 = scalar_lea.vmem (!%p1568_p2), [#allocation2], %s1434_s8 }
  0x8d   : > { %1137 = dma.done.wait (%p1569_p6), %s263_s5, 256  }
  0x8e   : > { %1139 = vsyncadd (%p1569_p6), %s263_s5, 4294967040  ;;  %s271_s28 = sand.u32 1, %s1225_s19   ;;  %s275_s13 = scalar_lea.vmem [#allocation5], %s1434_s8 }
  0x8f   : > { %s272_s10 = scalar_lea.sflag [#allocation6], %s271_s28 }
  0x90   : > { %1141 = dma.done.wait (%p1569_p6), %s272_s10, 512  }
  0x91   : > { %1143 = vsyncadd (%p1569_p6), %s272_s10, 4294966784  ;;  %s284_s23 = scalar_lea.vmem [#allocation7], %s1434_s8  ;;  %s290_s9 = scalar_lea.sflag [#allocation9], %s1431_s14 }
  0x92   : > { %s293_s7 = scalar_lea.vmem [#allocation8], %s1434_s8 }
  0x93   : > { %1145 = dma.done.wait (%p1569_p6), %s290_s9, 256  }
  0x94   : > { %1147 = vsyncadd (%p1569_p6), %s290_s9, 4294967040  ;;  %v1174_v0 = vmov 0.0   ;;  %vm1175_vm0 = vmmov 0   ;;  %vm340_vm1 = vcmask 523264   ;;  %v338_v1 = vld [vmem:[%s275_s13] sm:$0xff]  ;;  %vm419_vm3 = vcmask 64512  }
  0x95   : > { %877 = vmatprep.subr.mxu0 %v1174_v0  ;;  %879 = vmatprep.mubr.msk.f32.mxu0 %vm1175_vm0, %v1174_v0  ;;  %v337_v2 = vld [vmem:[%s266_s12] sm:$0xff]  ;;  %v853_v18 = vld [vmem:[%s275_s13 + $0x8] sm:$0xff]  ;;  %s1479_s25 = scalar_lea.vmem [#allocation10], %s1434_s8  ;;  %s868_s20 = sshll.u32 %s1225_s19, 8 }
  0x96   : > { %882 = vmatprep.subr.mxu1 %v1174_v0  ;;  %884 = vmatprep.mubr.msk.f32.mxu1 %vm1175_vm0, %v1174_v0  ;;  %v333_v3 = vld [vmem:[%s293_s7] sm:$0xff]  ;;  %v852_v19 = vld [vmem:[%s266_s12 + $0x8] sm:$0xff]  ;;  %s689_s24 = sshll.u32 %s1479_s25, 4  ;;  %s1497_s6 = scalar_lea.hbm %s1547_s4, %s868_s20  ;;  %s1492_s24 = int_to_ptr.vmem [resolvable:$true] %s689_s24 }
  0x97   : > { %878 = vmatpush3.xpose.msk.msra.mxu0 %vm340_vm1, %v338_v1  ;;  %vm335_vm2 = vcmp.ne.s32.totalorder %v333_v3, 0  ;;  %v339_v14 = vld [vmem:[%s284_s23] sm:$0xff]  ;;  %v334_v22 = vld [vmem:[%s293_s7 + $0x8] sm:$0xff]  ;;  %s676_s30 = scalar_lea.sflag [#allocation4], %s1431_s14  ;;  %s1092_s0 = scalar_lea.vmem %s1492_s24, 256 }
  0x98   : > { %892 = vmatprep.subr.mxu0 %v1174_v0  ;;  %883 = vmatpush3.msra.mxu1 %v339_v14  ;;  %vm336_vm4 = vcmp.ne.s32.totalorder %v334_v22, 0  ;;  %v854_v33 = vld [vmem:[%s284_s23 + $0x8] sm:$0xff]  ;;  %p1093_p13 = scmp.ne.s32.totalorder %s1492_s24, %s1092_s0  ;;  %p1570_p0 = scmp.ne.s32.totalorder %s1558_s26, 0 }
  0x99   : > { %887 = vmatprep.subr.mxu1 %v1174_v0  ;;  %s1176_s19 = smov [#allocation10]  }
  0x9a   : > { %880 = vmatmul.mubr.msk.f32.vlgmr.msra.gmra.mrb[0].mxu0 %vm340_vm1, %v337_v2  ;;  %p1094_p8 = pnand %p1093_p13, %p1570_p0  ;;  %s1096_s22 = sshll.u32 %s1176_s19, 4  ;;  %s1097_s22 = int_to_ptr.vmem [resolvable:$false] %s1096_s22 }
  0x9b   : > { %894 = vmatprep.mubr.msk.f32.mxu0 %vm1175_vm0, %v1174_v0  ;;  %893 = vmatpush3.msra.mxu0 %v854_v33  ;;  %s1098_s11 = scalar_lea.vmem %s1097_s22, 512  ;;  %p1099_p11 = scmp.lt.s32.totalorder %s1492_s24, %s1097_s22 }
  0x9c   : > { %p1095_p10 = pneg %p1094_p8  ;;  %p1100_p4 = scmp.lt.s32.totalorder %s1098_s11, %s1092_s0 }
  0x9e   : > { %p1101_p3 = por %p1100_p4, %p1099_p11 }
  0xa0   : > { %p1102_p5 = pnand %p1101_p3, %p1095_p10 }
 0x16d   : > { %v413_v4 = vpop.f32.mrb[0].mxu0 }
 0x16e   : > { %v417_v5 = vmul.f32 0.125, %v413_v4  ;;  %v881_v6 = vpop.f32.mrb[1].mxu0 }
 0x170   : > { %v418_v7 = vsel %vm335_vm2, -1e+09, %v417_v5 }
 0x171   : > { %v420_v8 = vsel %vm419_vm3, %v418_v7, -inf }
 0x172   : > { %421 = vmax.xlane.f32.xlu0 %v420_v8 }
 0x1ff   : > { %v422_v9 = vpop.xlane.xlu0 %421 }
 0x200   : > { %v423_v10 = vsub.f32 %v418_v7, %v422_v9 }
 0x202   : > { %v424_v11 = vmul.f32 1.442695, %v423_v10 }
 0x204   : > { %964 = vpow2.f32 %v424_v11 }
 0x20e   : > { %v965_v12 = vpop.eup %964 }
 0x20f   : > { %v426_v13 = vsel %vm419_vm3, %v965_v12, 0.0 }
 0x210   : > { %427 = vadd.xlane.f32.xlu0 %v426_v13 }
 0x29d   : > { %v428_v15 = vpop.xlane.xlu0 %427 }
 0x29e   : > { %966 = vrcp.f32 %v428_v15 }
 0x2a8   : > { %v967_v16 = vpop.eup %966 }
 0x2a9   : > { %v430_v17 = vmul.f32 %v967_v16, %v965_v12 }
 0x2ab   : > { %885 = vmatmul.mubr.msk.f32.vlgmr.msra.gmra.mrb[0].mxu1 %vm419_vm3, %v430_v17 }
 0x2ac   : > { %888 = vmatpush3.xpose.msk.msra.mxu1 %vm340_vm1, %v853_v18  ;;  %889 = vmatprep.mubr.msk.f32.mxu1 %vm1175_vm0, %v1174_v0 }
 0x2af   : > { %890 = vmatmul.mubr.msk.f32.vlgmr.msra.gmra.mrb[2].mxu1 %vm340_vm1, %v852_v19 }
 0x37e   : > { %v500_v20 = vpop.f32.mrb[0].mxu1 }
 0x37f   : > { %504 = vst.msk [vmem:[%s1479_s25] sm:$0xff] %vm340_vm1, %v500_v20  ;;  %v886_v21 = vpop.f32.mrb[1].mxu1 }
 0x382   : > { %v583_v23 = vpop.f32.mrb[2].mxu1 }
 0x383   : > { %v587_v24 = vmul.f32 0.125, %v583_v23  ;;  %v891_v25 = vpop.f32.mrb[3].mxu1 }
 0x385   : > { %v588_v26 = vsel %vm336_vm4, -1e+09, %v587_v24 }
 0x386   : > { %v589_v27 = vsel %vm419_vm3, %v588_v26, -inf }
 0x387   : > { %590 = vmax.xlane.f32.xlu1 %v589_v27 }
 0x414   : > { %v591_v28 = vpop.xlane.xlu1 %590 }
 0x415   : > { %v592_v29 = vsub.f32 %v588_v26, %v591_v28 }
 0x417   : > { %v593_v30 = vmul.f32 1.442695, %v592_v29 }
 0x419   : > { %968 = vpow2.f32 %v593_v30 }
 0x423   : > { %v969_v31 = vpop.eup %968 }
 0x424   : > { %v595_v32 = vsel %vm419_vm3, %v969_v31, 0.0 }
 0x425   : > { %596 = vadd.xlane.f32.xlu1 %v595_v32 }
 0x4b2   : > { %v597_v34 = vpop.xlane.xlu1 %596 }
 0x4b3   : > { %970 = vrcp.f32 %v597_v34 }
 0x4bd   : > { %v971_v35 = vpop.eup %970 }
 0x4be   : > { %v599_v36 = vmul.f32 %v971_v35, %v969_v31 }
 0x4c0   : > { %895 = vmatmul.mubr.msk.f32.vlgmr.msra.gmra.mrb[2].mxu0 %vm419_vm3, %v599_v36 }
 0x593   : > { %v669_v37 = vpop.f32.mrb[2].mxu0 }
 0x594   : > { %858 = vst.msk [vmem:[%s1479_s25 + $0x8] sm:$0xff] %vm340_vm1, %v669_v37  ;;  %v896_v38 = vpop.f32.mrb[3].mxu0 }
 0x595   : > { %1105 = shalt.err (!%p1102_p5)
}
 0x596   : > { %s1106_s8 = scalar_lea.hbm %s1497_s6, 256  ;;  %s1110_s28 = scalar_lea.hbm %s1547_s4, 512 }
 0x597   : > { %p1107_p1 = scmp.ne.s32.totalorder %s1497_s6, %s1106_s8  ;;  %p1111_p12 = scmp.lt.u32.totalorder %s1497_s6, %s1547_s4 }
 0x598   : > { %p1112_p2 = scmp.lt.u32.totalorder %s1110_s28, %s1106_s8  ;;  %p1114_p13 = scmp.lt.u32.totalorder %s1106_s8, %s1497_s6 }
 0x599   : > { %p1108_p7 = pnand %p1107_p1, %p1570_p0 }
 0x59a   : > { %p1113_p6 = por %p1112_p2, %p1111_p12 }
 0x59b   : > { %p1109_p9 = pneg %p1108_p7 }
 0x59c   : > { %p1115_p8 = por %p1114_p13, %p1113_p6 }
 0x59e   : > { %p1116_p10 = pnand %p1115_p8, %p1109_p9 }
 0x5a0   : > { %1119 = shalt.err (!%p1116_p10)
}
 0x5a1   : > { %s1177_s23 = smov 128   ;;  %s1178_s9 = smov 8  }
 0x5a2   : > { %905 = dma.vmem_to_hbm [thread:$0]  (%p1570_p0), %s1492_s24, 256, %s1497_s6, %s676_s30, %s1177_s23, %s1177_s23, %s1178_s9  }
 0x5a3 PF: > { %s704_s7 = sand.u32 1, %s1154_s15   ;;  %p1571_p11 = scmp.ne.s32.totalorder %s1559_s27, 0 }
 0x5a4   : > { %p1572_p4 = scmp.ge.s32.totalorder %s1166_s18, 2  ;;  %s705_s25 = scalar_lea.sflag [#allocation4], %s704_s7 }
 0x5a6   : > { %p921_p3 = pnand %p1572_p4, %p1571_p11 }
 0x5a8   : > { %1149 = dma.done.wait (!%p921_p3), %s705_s25, 256  }
 0x5a9   : > { %1151 = vsyncadd (!%p921_p3), %s705_s25, 4294967040  ;;  %s1573_s20 = sld [smem:[#allocation15_spill]]  ;;  %p23_p5 = scmp.ge.s32.totalorder %s1229_s21, 4  }
 0x5aa   : > { %s1574_s15 = smov %s1158_s16  ;;  %s1575_s16 = smov %s1162_s17 }
 0x5ab   : > { %s1577_s18 = smov %s1229_s21  ;;  %25 = sbr.rel (!%p23_p5) target bundleno = 12 (0xc), region = 122 }
 0x5af   : > { %s1576_s17 = smov %s1573_s20 }
 0x5b2   :  { %710 = vsyncpa [#allocation3], 1 }
 0x5b3   :  { %712 = vsyncpa [#allocation3 + $0x1], 1 }
 0x5b4   :  { %713 = vsyncpa [#allocation6], 1 }
 0x5b5   :  { %715 = vsyncpa [#allocation6 + $0x1], 1 }
 0x5b6   :  { %716 = vsyncpa [#allocation9], 1 }
 0x5b7   :  { %718 = vsyncpa [#allocation9 + $0x1], 1 }
 0x5b8   :  { %719 = vsyncpa [#allocation4], 1 }
 0x5b9   :  { %721 = vsyncpa [#allocation4 + $0x1], 1 }

</bundles_post_ra>
